<compile_context>
chip_gen: v7x
topology: tpu7x:2x2x1
jax: 0.10.0
libtpu: 0.0.40
codegen_flags: <defaults>
</compile_context>

<pallas_src>
import functools

import jax
import jax.numpy as jnp
from jax import lax
from jax.experimental import pallas as pl
from jax.experimental.pallas import tpu as pltpu


def mlp_kernel(x_ref,
               w1_ref, b1_ref,
               w2_ref, b2_ref,
               w3_ref, b3_ref,
               w4_ref, b4_ref,
               w5_ref, b5_ref,
               o_ref):
    """One batch tile of the whole MLP.

    x tile is (TB, 7) rows; layer 1 contracts x's feature axis directly
    (trans_b-style dot) producing (50, TB), after which all activations live in the
    transposed (features, TB) layout so the batch stays on the lane dimension.
    All matmuls are f32 operands / f32 accumulation; bias-add + ReLU are f32 VPU ops.
    """
    x = x_ref[...]                                                        # (TB, 7) f32

    # Layer 1: w1 (50, 7) . x^T (7, TB) -> (50, TB), contracting both lane axes.
    h = lax.dot_general(w1_ref[...], x,
                        dimension_numbers=(((1,), (1,)), ((), ())),
                        preferred_element_type=jnp.float32)
    h = jnp.maximum(h + b1_ref[...], 0.0)                                 # (50, TB)

    h = jnp.maximum(
        jnp.dot(w2_ref[...], h, preferred_element_type=jnp.float32) + b2_ref[...], 0.0)
    h = jnp.maximum(
        jnp.dot(w3_ref[...], h, preferred_element_type=jnp.float32) + b3_ref[...], 0.0)
    h = jnp.maximum(
        jnp.dot(w4_ref[...], h, preferred_element_type=jnp.float32) + b4_ref[...], 0.0)

    o_ref[...] = (
        jnp.dot(w5_ref[...], h, preferred_element_type=jnp.float32) + b5_ref[...]
    )                                                                     # (2, TB)


@functools.partial(jax.jit, static_argnames=("tile_b",))
def fully_connected_layer_forward(x, params, *, tile_b=8192):
    """x: (batch, 7) f32.  params: list of (W, b), W (in, out) f32, b (1, out) f32.

    tile_b: batch rows per grid step (lane width of each tile).  8192 amortises the
    per-step pipeline overhead and keeps live VMEM (~15 MiB) under v7x's 32 MiB scoped
    default; sweep 4096-16384 on v5e/v6e which have far more headroom.
    """
    batch, in_features = x.shape
    out_features = params[-1][0].shape[1]

    # Lane dim must be a multiple of 128.  For batches spanning >= 2 lane groups,
    # force >= 2 grid steps so v7x's two TensorCores both get work ("parallel" axis).
    lanes = pl.cdiv(batch, 128) * 128
    if lanes >= 256:
        tb = min(tile_b, pl.cdiv(lanes // 2, 128) * 128)
    else:
        tb = lanes
    padded = pl.cdiv(batch, tb) * tb

    # Batch stays as rows -- no wrapper-side transpose materialisation, just a pad.
    xp = jnp.pad(x.astype(jnp.float32), ((0, padded - batch), (0, 0)))   # (padded, 7)

    # Weights transposed to (out, in); biases as (out, 1) columns.  All f32,
    # VMEM-resident for the whole grid (constant index_map).
    flat = []
    for w, b in params:
        flat.append(w.T.astype(jnp.float32))
        flat.append(b.T.astype(jnp.float32))

    const_spec = lambda a: pl.BlockSpec(a.shape, lambda i: (0, 0))
    in_specs = [pl.BlockSpec((tb, in_features), lambda i: (i, 0))]
    in_specs += [const_spec(a) for a in flat]

    out_t = pl.pallas_call(
        mlp_kernel,
        out_shape=jax.ShapeDtypeStruct((out_features, padded), jnp.float32),
        grid=(padded // tb,),
        in_specs=in_specs,
        out_specs=pl.BlockSpec((out_features, tb), lambda i: (0, i)),
        compiler_params=pltpu.CompilerParams(
            dimension_semantics=("parallel",)),   # megacore-shardable on v7x
    )(xp, *flat)

    # Padded columns carry bias-propagated garbage; slice them off before returning.
    return out_t[:, :batch].T                                             # (batch, 2)


def init_params(key):
    """Mirror nn.Linear default init: U(-1/sqrt(fan_in), +1/sqrt(fan_in))."""
    sizes = [(7, 50), (50, 50), (50, 50), (50, 50), (50, 2)]
    params = []
    for (fan_in, fan_out) in sizes:
        key, kw, kb = jax.random.split(key, 3)
        bound = 1.0 / jnp.sqrt(fan_in)
        w = jax.random.uniform(kw, (fan_in, fan_out), jnp.float32, -bound, bound)
        b = jax.random.uniform(kb, (1, fan_out), jnp.float32, -bound, bound)
        params.append((w, b))
    return params


def reference_forward(x, params):
    h = x
    for i, (w, b) in enumerate(params):
        h = h @ w + b
        if i < len(params) - 1:
            h = jnp.maximum(h, 0.0)
    return h


if __name__ == "__main__":
    key = jax.random.PRNGKey(0)
    key, kx = jax.random.split(key)

    batch = 8
    x = jax.random.normal(kx, (batch, 7), jnp.float32)
    params = init_params(key)

    out = fully_connected_layer_forward(x, params)
    out = jax.block_until_ready(out)

    ref = reference_forward(x, params)
    assert out.shape == (batch, 2), out.shape
    # Full f32 matmuls now -> tight tolerance vs the f32 reference.
    assert jnp.allclose(out, ref, atol=1e-4, rtol=1e-4), (out, ref)

    print("KERNEL_OK")
</pallas_src>

<mosaic_0001>
module attributes {stable_mosaic.version = 11 : i64} {
  func.func @mlp_kernel(%arg0: i32, %arg1: memref<128x7xf32, #tpu.memory_space<vmem>>, %arg2: memref<50x7xf32, #tpu.memory_space<vmem>>, %arg3: memref<50x1xf32, #tpu.memory_space<vmem>>, %arg4: memref<50x50xf32, #tpu.memory_space<vmem>>, %arg5: memref<50x1xf32, #tpu.memory_space<vmem>>, %arg6: memref<50x50xf32, #tpu.memory_space<vmem>>, %arg7: memref<50x1xf32, #tpu.memory_space<vmem>>, %arg8: memref<50x50xf32, #tpu.memory_space<vmem>>, %arg9: memref<50x1xf32, #tpu.memory_space<vmem>>, %arg10: memref<2x50xf32, #tpu.memory_space<vmem>>, %arg11: memref<2x1xf32, #tpu.memory_space<vmem>>, %arg12: memref<2x128xf32, #tpu.memory_space<vmem>>) attributes {dimension_semantics = [#tpu.dimension_semantics<parallel>], iteration_bounds = array<i64: 1>, scalar_prefetch = 0 : i64, scratch_operands = 0 : i64, tpu.core_type = #tpu.core_type<tc>, window_params = [{transform_indices = @transform_0, window_bounds = array<i64: 128, 7>}, {pipeline_mode = #tpu.pipeline_mode<synchronous>, transform_indices = @transform_1, window_bounds = array<i64: 50, 7>}, {pipeline_mode = #tpu.pipeline_mode<synchronous>, transform_indices = @transform_2, window_bounds = array<i64: 50, 1>}, {pipeline_mode = #tpu.pipeline_mode<synchronous>, transform_indices = @transform_3, window_bounds = array<i64: 50, 50>}, {pipeline_mode = #tpu.pipeline_mode<synchronous>, transform_indices = @transform_4, window_bounds = array<i64: 50, 1>}, {pipeline_mode = #tpu.pipeline_mode<synchronous>, transform_indices = @transform_5, window_bounds = array<i64: 50, 50>}, {pipeline_mode = #tpu.pipeline_mode<synchronous>, transform_indices = @transform_6, window_bounds = array<i64: 50, 1>}, {pipeline_mode = #tpu.pipeline_mode<synchronous>, transform_indices = @transform_7, window_bounds = array<i64: 50, 50>}, {pipeline_mode = #tpu.pipeline_mode<synchronous>, transform_indices = @transform_8, window_bounds = array<i64: 50, 1>}, {pipeline_mode = #tpu.pipeline_mode<synchronous>, transform_indices = @transform_9, window_bounds = array<i64: 2, 50>}, {pipeline_mode = #tpu.pipeline_mode<synchronous>, transform_indices = @transform_10, window_bounds = array<i64: 2, 1>}, {transform_indices = @transform_11, window_bounds = array<i64: 2, 128>}]} {
    %c0 = arith.constant 0 : index
    %c0_0 = arith.constant 0 : index
    %0 = vector.load %arg1[%c0, %c0_0] : memref<128x7xf32, #tpu.memory_space<vmem>>, vector<128x7xf32>
    %c0_1 = arith.constant 0 : index
    %c0_2 = arith.constant 0 : index
    %1 = vector.load %arg2[%c0_1, %c0_2] : memref<50x7xf32, #tpu.memory_space<vmem>>, vector<50x7xf32>
    %cst = arith.constant dense<0.000000e+00> : vector<50x128xf32>
    %2 = tpu.matmul %1, %0, %cst {dimension_numbers = #tpu.dot_dimension_numbers<[1], [1], [0], [0], [0, 0, 1, 0], [], []>} : vector<50x7xf32>, vector<128x7xf32>, vector<50x128xf32> -> vector<50x128xf32>
    %c0_3 = arith.constant 0 : index
    %c0_4 = arith.constant 0 : index
    %3 = vector.load %arg3[%c0_3, %c0_4] : memref<50x1xf32, #tpu.memory_space<vmem>>, vector<50x1xf32>
    %4 = vector.broadcast %3 : vector<50x1xf32> to vector<50x128xf32>
    %5 = arith.addf %2, %4 : vector<50x128xf32>
    %cst_5 = arith.constant 0.000000e+00 : f32
    %6 = vector.broadcast %cst_5 : f32 to vector<50x128xf32>
    %7 = arith.maximumf %5, %6 : vector<50x128xf32>
    %c0_6 = arith.constant 0 : index
    %c0_7 = arith.constant 0 : index
    %8 = vector.load %arg4[%c0_6, %c0_7] : memref<50x50xf32, #tpu.memory_space<vmem>>, vector<50x50xf32>
    %cst_8 = arith.constant dense<0.000000e+00> : vector<50x128xf32>
    %9 = tpu.matmul %8, %7, %cst_8 {dimension_numbers = #tpu.dot_dimension_numbers<[1], [0], [0], [1], [0, 0, 1, 1], [], []>} : vector<50x50xf32>, vector<50x128xf32>, vector<50x128xf32> -> vector<50x128xf32>
    %c0_9 = arith.constant 0 : index
    %c0_10 = arith.constant 0 : index
    %10 = vector.load %arg5[%c0_9, %c0_10] : memref<50x1xf32, #tpu.memory_space<vmem>>, vector<50x1xf32>
    %11 = vector.broadcast %10 : vector<50x1xf32> to vector<50x128xf32>
    %12 = arith.addf %9, %11 : vector<50x128xf32>
    %cst_11 = arith.constant 0.000000e+00 : f32
    %13 = vector.broadcast %cst_11 : f32 to vector<50x128xf32>
    %14 = arith.maximumf %12, %13 : vector<50x128xf32>
    %c0_12 = arith.constant 0 : index
    %c0_13 = arith.constant 0 : index
    %15 = vector.load %arg6[%c0_12, %c0_13] : memref<50x50xf32, #tpu.memory_space<vmem>>, vector<50x50xf32>
    %cst_14 = arith.constant dense<0.000000e+00> : vector<50x128xf32>
    %16 = tpu.matmul %15, %14, %cst_14 {dimension_numbers = #tpu.dot_dimension_numbers<[1], [0], [0], [1], [0, 0, 1, 1], [], []>} : vector<50x50xf32>, vector<50x128xf32>, vector<50x128xf32> -> vector<50x128xf32>
    %c0_15 = arith.constant 0 : index
    %c0_16 = arith.constant 0 : index
    %17 = vector.load %arg7[%c0_15, %c0_16] : memref<50x1xf32, #tpu.memory_space<vmem>>, vector<50x1xf32>
    %18 = vector.broadcast %17 : vector<50x1xf32> to vector<50x128xf32>
    %19 = arith.addf %16, %18 : vector<50x128xf32>
    %cst_17 = arith.constant 0.000000e+00 : f32
    %20 = vector.broadcast %cst_17 : f32 to vector<50x128xf32>
    %21 = arith.maximumf %19, %20 : vector<50x128xf32>
    %c0_18 = arith.constant 0 : index
    %c0_19 = arith.constant 0 : index
    %22 = vector.load %arg8[%c0_18, %c0_19] : memref<50x50xf32, #tpu.memory_space<vmem>>, vector<50x50xf32>
    %cst_20 = arith.constant dense<0.000000e+00> : vector<50x128xf32>
    %23 = tpu.matmul %22, %21, %cst_20 {dimension_numbers = #tpu.dot_dimension_numbers<[1], [0], [0], [1], [0, 0, 1, 1], [], []>} : vector<50x50xf32>, vector<50x128xf32>, vector<50x128xf32> -> vector<50x128xf32>
    %c0_21 = arith.constant 0 : index
    %c0_22 = arith.constant 0 : index
    %24 = vector.load %arg9[%c0_21, %c0_22] : memref<50x1xf32, #tpu.memory_space<vmem>>, vector<50x1xf32>
    %25 = vector.broadcast %24 : vector<50x1xf32> to vector<50x128xf32>
    %26 = arith.addf %23, %25 : vector<50x128xf32>
    %cst_23 = arith.constant 0.000000e+00 : f32
    %27 = vector.broadcast %cst_23 : f32 to vector<50x128xf32>
    %28 = arith.maximumf %26, %27 : vector<50x128xf32>
    %c0_24 = arith.constant 0 : index
    %c0_25 = arith.constant 0 : index
    %29 = vector.load %arg10[%c0_24, %c0_25] : memref<2x50xf32, #tpu.memory_space<vmem>>, vector<2x50xf32>
    %cst_26 = arith.constant dense<0.000000e+00> : vector<2x128xf32>
    %30 = tpu.matmul %29, %28, %cst_26 {dimension_numbers = #tpu.dot_dimension_numbers<[1], [0], [0], [1], [0, 0, 1, 1], [], []>} : vector<2x50xf32>, vector<50x128xf32>, vector<2x128xf32> -> vector<2x128xf32>
    %c0_27 = arith.constant 0 : index
    %c0_28 = arith.constant 0 : index
    %31 = vector.load %arg11[%c0_27, %c0_28] : memref<2x1xf32, #tpu.memory_space<vmem>>, vector<2x1xf32>
    %32 = vector.broadcast %31 : vector<2x1xf32> to vector<2x128xf32>
    %33 = arith.addf %30, %32 : vector<2x128xf32>
    %c0_29 = arith.constant 0 : index
    %c0_30 = arith.constant 0 : index
    %34 = vector.load %arg12[%c0_29, %c0_30] : memref<2x128xf32, #tpu.memory_space<vmem>>, vector<2x128xf32>
    tpu.vector_store %arg12[%c0_29, %c0_30], %33 {strides = array<i32>} : memref<2x128xf32, #tpu.memory_space<vmem>>, vector<2x128xf32>,
    return
  }
  func.func @transform_0(%arg0: i32) -> (i32, i32) {
    %c0_i32 = arith.constant 0 : i32
    %c0_i32_0 = arith.constant 0 : i32
    return %arg0, %c0_i32 : i32, i32
  }
  func.func @transform_1(%arg0: i32) -> (i32, i32) {
    %c0_i32 = arith.constant 0 : i32
    %c0_i32_0 = arith.constant 0 : i32
    %c0_i32_1 = arith.constant 0 : i32
    return %c0_i32, %c0_i32_0 : i32, i32
  }
  func.func @transform_2(%arg0: i32) -> (i32, i32) {
    %c0_i32 = arith.constant 0 : i32
    %c0_i32_0 = arith.constant 0 : i32
    %c0_i32_1 = arith.constant 0 : i32
    return %c0_i32, %c0_i32_0 : i32, i32
  }
  func.func @transform_3(%arg0: i32) -> (i32, i32) {
    %c0_i32 = arith.constant 0 : i32
    %c0_i32_0 = arith.constant 0 : i32
    %c0_i32_1 = arith.constant 0 : i32
    return %c0_i32, %c0_i32_0 : i32, i32
  }
  func.func @transform_4(%arg0: i32) -> (i32, i32) {
    %c0_i32 = arith.constant 0 : i32
    %c0_i32_0 = arith.constant 0 : i32
    %c0_i32_1 = arith.constant 0 : i32
    return %c0_i32, %c0_i32_0 : i32, i32
  }
  func.func @transform_5(%arg0: i32) -> (i32, i32) {
    %c0_i32 = arith.constant 0 : i32
    %c0_i32_0 = arith.constant 0 : i32
    %c0_i32_1 = arith.constant 0 : i32
    return %c0_i32, %c0_i32_0 : i32, i32
  }
  func.func @transform_6(%arg0: i32) -> (i32, i32) {
    %c0_i32 = arith.constant 0 : i32
    %c0_i32_0 = arith.constant 0 : i32
    %c0_i32_1 = arith.constant 0 : i32
    return %c0_i32, %c0_i32_0 : i32, i32
  }
  func.func @transform_7(%arg0: i32) -> (i32, i32) {
    %c0_i32 = arith.constant 0 : i32
    %c0_i32_0 = arith.constant 0 : i32
    %c0_i32_1 = arith.constant 0 : i32
    return %c0_i32, %c0_i32_0 : i32, i32
  }
  func.func @transform_8(%arg0: i32) -> (i32, i32) {
    %c0_i32 = arith.constant 0 : i32
    %c0_i32_0 = arith.constant 0 : i32
    %c0_i32_1 = arith.constant 0 : i32
    return %c0_i32, %c0_i32_0 : i32, i32
  }
  func.func @transform_9(%arg0: i32) -> (i32, i32) {
    %c0_i32 = arith.constant 0 : i32
    %c0_i32_0 = arith.constant 0 : i32
    %c0_i32_1 = arith.constant 0 : i32
    return %c0_i32, %c0_i32_0 : i32, i32
  }
  func.func @transform_10(%arg0: i32) -> (i32, i32) {
    %c0_i32 = arith.constant 0 : i32
    %c0_i32_0 = arith.constant 0 : i32
    %c0_i32_1 = arith.constant 0 : i32
    return %c0_i32, %c0_i32_0 : i32, i32
  }
  func.func @transform_11(%arg0: i32) -> (i32, i32) {
    %c0_i32 = arith.constant 0 : i32
    %c0_i32_0 = arith.constant 0 : i32
    return %c0_i32, %arg0 : i32, i32
  }
}

</mosaic_0001>

<bundles_post_ra>
// kernel: fully_connected_layer_forward.1
= control target key start
LH: loop header
LB: loop body
LE: loop exit
PB: predicated region body
PF: predicated region fallthrough
CT: control target
= control target key end

     0   :  { %vm103_vm0 = vcmask 56320   ;;  %v1281_v0 = vmov 0.0|0.0   ;;  %vm1282_vm2 = vmmov 0   ;;  %v1283_v4 = vmov 0.0   ;;  %s1707_s0 = inlined_call_operand.vmem [shape: f32[128,7], index: 0, kind: input, shape index: {}]   ;;  %s1708_s2 = inlined_call_operand.vmem [shape: f32[50,1], index: 2, kind: input, shape index: {}]   ;;  %s1709_s4 = inlined_call_operand.vmem [shape: f32[50,1], index: 4, kind: input, shape index: {}]   ;;  %s1710_s6 = inlined_call_operand.vmem [shape: f32[50,1], index: 6, kind: input, shape index: {}]   ;;  %s1711_s8 = inlined_call_operand.vmem [shape: f32[50,1], index: 8, kind: input, shape index: {}]   ;;  %s1712_s10 = inlined_call_operand.vmem [shape: f32[2,1], index: 10, kind: input, shape index: {}]   ;;  %s1713_s1 = inlined_call_operand.vmem [shape: f32[50,7], index: 1, kind: input, shape index: {}]   ;;  %s1714_s3 = inlined_call_operand.vmem [shape: f32[50,50], index: 3, kind: input, shape index: {}]   ;;  %s1715_s5 = inlined_call_operand.vmem [shape: f32[50,50], index: 5, kind: input, shape index: {}]   ;;  %s1716_s7 = inlined_call_operand.vmem [shape: f32[50,50], index: 7, kind: input, shape index: {}]   ;;  %s1717_s9 = inlined_call_operand.vmem [shape: f32[2,50], index: 9, kind: input, shape index: {}]   ;;  %s1718_s11 = inlined_call_operand.vmem [shape: f32[2,128], index: 11, kind: output, shape index: {}]  }
   0x1   :  { %1207 = vmatprep.subr.bf16.mxu0 %v1281_v0  ;;  %v38_v1 = vld [vmem:[%s1707_s0] sm:$0xff]  ;;  %v39_v2 = vld [vmem:[%s1707_s0 + $0x8] sm:$0xff]  ;;  %vm1354_vm1 = vmpackc.low %vm103_vm0, %vm103_vm0  ;;  %1064 = vmatprep.mubr.msk.f32.mxu0 %vm1282_vm2, %v1283_v4  ;;  %v1284_v6 = vmov 0   ;;  %vm351_vm3 = vcmask 1041408   ;;  %vm329_vm4 = vcmask 408576  }
   0x2   :  { %v1208_v5 = vpack.c.bf16 %v39_v2, %v38_v1  ;;  %1279 = vset.pattern.permute.xlu0 %v1284_v6  ;;  %1280 = vset.pattern.permute.xlu1 %v1284_v6  ;;  %v40_v7 = vld [vmem:[%s1707_s0 + $0x10] sm:$0xff]  ;;  %v41_v8 = vld [vmem:[%s1707_s0 + $0x18] sm:$0xff]  ;;  %v61_v10 = vld [vmem:[%s1708_s2] sm:$0xff] }
   0x3   :  { %1239 = vmatprep.subr.bf16.mxu1 %v1281_v0  ;;  %1099 = vmatprep.mubr.msk.f32.mxu1 %vm1282_vm2, %v1283_v4  ;;  %v1212_v9 = vpack.c.bf16 %v41_v8, %v40_v7  ;;  %v63_v11 = vld [vmem:[%s1708_s2 + $0x10] sm:$0xff]  ;;  %v62_v12 = vld [vmem:[%s1708_s2 + $0x8] sm:$0xff]  ;;  %v64_v13 = vld [vmem:[%s1708_s2 + $0x18] sm:$0xff] }
   0x4   :  { %1210 = vmatpush3.bf16.xpose.msk.msra.mxu0 %vm1354_vm1, %v1208_v5  ;;  %70 = vperm.xlu0 %1279, %v61_v10   ;;  %v42_v14 = vld [vmem:[%s1707_s0 + $0x20] sm:$0xff]  ;;  %v43_v15 = vld [vmem:[%s1707_s0 + $0x28] sm:$0xff]  ;;  %v67_v19 = vld [vmem:[%s1708_s2 + $0x30] sm:$0x3] }
   0x5   :  { %1211 = vmatprep.subr.bf16.mxu0 %v1281_v0  ;;  %80 = vperm.xlu1 %1280, %v63_v11   ;;  %v65_v16 = vld [vmem:[%s1708_s2 + $0x20] sm:$0xff]  ;;  %v66_v17 = vld [vmem:[%s1708_s2 + $0x28] sm:$0xff]  ;;  %v1216_v18 = vpack.c.bf16 %v43_v15, %v42_v14  ;;  %v44_v21 = vld [vmem:[%s1707_s0 + $0x30] sm:$0xff] }
   0x6   :  { %v287_v20 = vld [vmem:[%s1709_s4] sm:$0xff]  ;;  %v45_v22 = vld [vmem:[%s1707_s0 + $0x38] sm:$0xff]  ;;  %v288_v23 = vld [vmem:[%s1709_s4 + $0x8] sm:$0xff] }
   0x7   :  { %v289_v24 = vld [vmem:[%s1709_s4 + $0x10] sm:$0xff]  ;;  %v1220_v25 = vpack.c.bf16 %v45_v22, %v44_v21  ;;  %v290_v26 = vld [vmem:[%s1709_s4 + $0x18] sm:$0xff]  ;;  %v291_v27 = vld [vmem:[%s1709_s4 + $0x20] sm:$0xff] }
   0x8   :  { %75 = vperm.xlu0 %1279, %v62_v12   ;;  %v46_v28 = vld [vmem:[%s1707_s0 + $0x40] sm:$0xff]  ;;  %v47_v29 = vld [vmem:[%s1707_s0 + $0x48] sm:$0xff]  ;;  %v293_v31 = vld [vmem:[%s1709_s4 + $0x30] sm:$0x3] }
   0x9   :  { %85 = vperm.xlu1 %1280, %v64_v13   ;;  %v292_v30 = vld [vmem:[%s1709_s4 + $0x28] sm:$0xff]  ;;  %v1224_v32 = vpack.c.bf16 %v47_v29, %v46_v28  ;;  %v469_v33 = vld [vmem:[%s1710_s6] sm:$0xff]  ;;  %v48_v35 = vld [vmem:[%s1707_s0 + $0x50] sm:$0xff] }
   0xa   :  { %v470_v34 = vld [vmem:[%s1710_s6 + $0x8] sm:$0xff]  ;;  %v49_v36 = vld [vmem:[%s1707_s0 + $0x58] sm:$0xff]  ;;  %v471_v37 = vld [vmem:[%s1710_s6 + $0x10] sm:$0xff] }
   0xb   :  { %v472_v38 = vld [vmem:[%s1710_s6 + $0x18] sm:$0xff]  ;;  %v1228_v39 = vpack.c.bf16 %v49_v36, %v48_v35  ;;  %v473_v40 = vld [vmem:[%s1710_s6 + $0x20] sm:$0xff]  ;;  %v474_v41 = vld [vmem:[%s1710_s6 + $0x28] sm:$0xff] }
   0xc   :  { %1214 = vmatpush3.bf16.xpose.msk.msra.mxu0 %vm1354_vm1, %v1212_v9  ;;  %90 = vperm.xlu0 %1279, %v65_v16   ;;  %v50_v42 = vld [vmem:[%s1707_s0 + $0x60] sm:$0xff]  ;;  %v51_v43 = vld [vmem:[%s1707_s0 + $0x68] sm:$0xff]  ;;  %v475_v44 = vld [vmem:[%s1710_s6 + $0x30] sm:$0x3] }
   0xd   :  { %1215 = vmatprep.subr.bf16.mxu0 %v1281_v0  ;;  %95 = vperm.xlu1 %1280, %v66_v17   ;;  %v649_v45 = vld [vmem:[%s1711_s8] sm:$0xff]  ;;  %v1232_v46 = vpack.c.bf16 %v51_v43, %v50_v42  ;;  %v650_v47 = vld [vmem:[%s1711_s8 + $0x8] sm:$0xff]  ;;  %v651_v48 = vld [vmem:[%s1711_s8 + $0x10] sm:$0xff] }
   0xe   :  { %v52_v49 = vld [vmem:[%s1707_s0 + $0x70] sm:$0xff]  ;;  %v53_v50 = vld [vmem:[%s1707_s0 + $0x78] sm:$0xff]  ;;  %v653_v52 = vld [vmem:[%s1711_s8 + $0x20] sm:$0xff] }
   0xf   :  { %v652_v51 = vld [vmem:[%s1711_s8 + $0x18] sm:$0xff]  ;;  %v1236_v53 = vpack.c.bf16 %v53_v50, %v52_v49  ;;  %v654_v54 = vld [vmem:[%s1711_s8 + $0x28] sm:$0xff]  ;;  %v655_v55 = vld [vmem:[%s1711_s8 + $0x30] sm:$0x3] }
  0x10   :  { %100 = vperm.xlu0 %1279, %v67_v19   ;;  %v823_v56 = vld [vmem:[%s1712_s10] sm:$0x3]  ;;  %v55_v58 = vld [vmem:[%s1713_s1 + $0x8] sm:$0xff]  ;;  %v56_v59 = vld [vmem:[%s1713_s1 + $0x10] sm:$0xff] }
  0x11   :  { %296 = vperm.xlu1 %1280, %v287_v20   ;;  %v54_v57 = vld [vmem:[%s1713_s1] sm:$0xff]  ;;  %v57_v60 = vld [vmem:[%s1713_s1 + $0x18] sm:$0xff]  ;;  %v59_v62 = vld [vmem:[%s1713_s1 + $0x28] sm:$0xff] }
  0x12   :  { %v58_v61 = vld [vmem:[%s1713_s1 + $0x20] sm:$0xff]  ;;  %v60_v63 = vld [vmem:[%s1713_s1 + $0x30] sm:$0x3]  ;;  %v283_v43 = vld [vmem:[%s1714_s3 + $0x18] sm:$0xff] }
  0x13   :  { %v282_v42 = vld [vmem:[%s1714_s3 + $0x10] sm:$0xff] }
  0x14   :  { %1218 = vmatpush3.bf16.xpose.msk.msra.mxu0 %vm1354_vm1, %v1216_v18  ;;  %301 = vperm.xlu0 %1279, %v288_v23  }
  0x15   :  { %1219 = vmatprep.subr.bf16.mxu0 %v1281_v0  ;;  %306 = vperm.xlu1 %1280, %v289_v24  }
  0x18   :  { %311 = vperm.xlu0 %1279, %v290_v26  }
  0x19   :  { %316 = vperm.xlu1 %1280, %v291_v27  }
  0x1c   :  { %1222 = vmatpush3.bf16.xpose.msk.msra.mxu0 %vm1354_vm1, %v1220_v25  ;;  %321 = vperm.xlu0 %1279, %v292_v30  }
  0x1d   :  { %1223 = vmatprep.subr.bf16.mxu0 %v1281_v0  ;;  %326 = vperm.xlu1 %1280, %v293_v31  }
  0x20   :  { %478 = vperm.xlu0 %1279, %v469_v33  }
  0x21   :  { %483 = vperm.xlu1 %1280, %v470_v34  }
  0x24   :  { %1226 = vmatpush3.bf16.xpose.msk.msra.mxu0 %vm1354_vm1, %v1224_v32  ;;  %488 = vperm.xlu0 %1279, %v471_v37  }
  0x25   :  { %1227 = vmatprep.subr.bf16.mxu0 %v1281_v0  ;;  %493 = vperm.xlu1 %1280, %v472_v38  }
  0x28   :  { %498 = vperm.xlu0 %1279, %v473_v40   ;;  %v280_v40 = vld [vmem:[%s1714_s3] sm:$0xff] }
  0x29   :  { %503 = vperm.xlu1 %1280, %v474_v41   ;;  %v281_v41 = vld [vmem:[%s1714_s3 + $0x8] sm:$0xff] }
  0x2c   :  { %1230 = vmatpush3.bf16.xpose.msk.msra.mxu0 %vm1354_vm1, %v1228_v39  ;;  %508 = vperm.xlu0 %1279, %v475_v44   ;;  %v284_v44 = vld [vmem:[%s1714_s3 + $0x20] sm:$0xff] }
  0x2d   :  { %1231 = vmatprep.subr.bf16.mxu0 %v1281_v0  ;;  %658 = vperm.xlu1 %1280, %v649_v45   ;;  %v285_v45 = vld [vmem:[%s1714_s3 + $0x28] sm:$0xff] }
  0x30   :  { %663 = vperm.xlu0 %1279, %v650_v47  }
  0x31   :  { %668 = vperm.xlu1 %1280, %v651_v48  }
  0x34   :  { %1234 = vmatpush3.bf16.xpose.msk.msra.mxu0 %vm1354_vm1, %v1232_v46  ;;  %673 = vperm.xlu0 %1279, %v652_v51   ;;  %v286_v46 = vld [vmem:[%s1714_s3 + $0x30] sm:$0x3] }
  0x35   :  { %1235 = vmatprep.subr.bf16.mxu0 %v1281_v0  ;;  %678 = vperm.xlu1 %1280, %v653_v52  }
  0x38   :  { %683 = vperm.xlu0 %1279, %v654_v54  }
  0x39   :  { %688 = vperm.xlu1 %1280, %v655_v55  }
  0x3c   :  { %1238 = vmatpush3.bf16.xpose.msk.msra.mxu0 %vm1354_vm1, %v1236_v53  ;;  %826 = vperm.xlu0 %1279, %v823_v56  }
  0x3d   :  { %1266 = vmatprep.subr.bf16.mxu0 %v1281_v0 }
  0x43   :  { %1065 = vmatmul.mubr.msk.f32.vlgmr.msra.gmra.mrb[0].mxu0 %vm103_vm0, %v54_v57 }
  0x44   :  { %1067 = vmatprep.mubr.msk.f32.mxu0 %vm1282_vm2, %v1283_v4 }
  0x47   :  { %1068 = vmatmul.mubr.msk.f32.gmra.mrb[2].mxu0 %vm103_vm0, %v55_v58 }
  0x48   :  { %1070 = vmatprep.mubr.msk.f32.mxu0 %vm1282_vm2, %v1283_v4 }
  0x4b   :  { %1071 = vmatmul.mubr.msk.f32.gmra.mrb[4].mxu0 %vm103_vm0, %v56_v59 }
  0x4c   :  { %1073 = vmatprep.mubr.msk.f32.mxu0 %vm1282_vm2, %v1283_v4 }
  0x4f   :  { %1074 = vmatmul.mubr.msk.f32.gmra.mrb[6].mxu0 %vm103_vm0, %v57_v60 }
  0x50   :  { %1076 = vmatprep.mubr.msk.f32.mxu0 %vm1282_vm2, %v1283_v4 }
  0x53   :  { %1077 = vmatmul.mubr.msk.f32.gmra.mrb[8].mxu0 %vm103_vm0, %v58_v61 }
  0x54   :  { %1079 = vmatprep.mubr.msk.f32.mxu0 %vm1282_vm2, %v1283_v4 }
  0x57   :  { %1080 = vmatmul.mubr.msk.f32.gmra.mrb[10].mxu0 %vm103_vm0, %v59_v62 }
  0x58   :  { %1082 = vmatprep.mubr.msk.f32.mxu0 %vm1282_vm2, %v1283_v4 }
  0x5b   :  { %1083 = vmatmul.mubr.msk.f32.gmra.mrb[12].mxu0 %vm103_vm0, %v60_v63 }
  0x5c   :  { %1204 = vmatprep.mubr.msk.f32.mxu0 %vm1282_vm2, %v1283_v4 }
  0x83   :  { %v71_v1 = vpop.permute.xlu0 %70 }
  0x84   :  { %v81_v10 = vpop.permute.xlu1 %80 }
  0x87   :  { %v76_v6 = vpop.permute.xlu0 %75 }
  0x88   :  { %v86_v17 = vpop.permute.xlu1 %85 }
  0x8b   :  { %v91_v26 = vpop.permute.xlu0 %90 }
  0x8c   :  { %v96_v28 = vpop.permute.xlu1 %95 }
  0x8f   :  { %v101_v34 = vpop.permute.xlu0 %100 }
  0x90   :  { %v297_v49 = vpop.permute.xlu1 %296 }
  0x93   :  { %v302_v51 = vpop.permute.xlu0 %301 }
  0x94   :  { %v307_v60 = vpop.permute.xlu1 %306 }
  0x97   :  { %v312_v62 = vpop.permute.xlu0 %311 }
 0x116   :  { %v239_v2 = vpop.f32.mrb[0].mxu0 }
 0x117   :  { %v1066_v3 = vpop.f32.mrb[1].mxu0  ;;  %v240_v5 = vadd.f32 %v239_v2, %v71_v1 }
 0x119   :  { %v273_v11 = vmax.f32 %v240_v5, 0.0 }
 0x11a   :  { %v244_v7 = vpop.f32.mrb[2].mxu0 }
 0x11b   :  { %v245_v8 = vadd.f32 %v244_v7, %v76_v6  ;;  %v1069_v9 = vpop.f32.mrb[3].mxu0 }
 0x11c   :  { %v317_v9 = vpop.permute.xlu1 %316 }
 0x11d   :  { %v274_v12 = vmax.f32 %v245_v8, 0.0 }
 0x11e   :  { %v249_v13 = vpop.f32.mrb[4].mxu0 }
 0x11f   :  { %v1072_v14 = vpop.f32.mrb[5].mxu0  ;;  %v1240_v15 = vpack.c.bf16 %v274_v12, %v273_v11  ;;  %v250_v16 = vadd.f32 %v249_v13, %v81_v10  ;;  %v322_v11 = vpop.permute.xlu0 %321 }
 0x121   :  { %1241 = vmatpush3.bf16.msra.mxu1 %v1240_v15  ;;  %v275_v21 = vmax.f32 %v250_v16, 0.0 }
 0x122   :  { %v254_v18 = vpop.f32.mrb[6].mxu0  ;;  %1242 = vmatprep.subr.bf16.mxu1 %v1281_v0 }
 0x123   :  { %v255_v19 = vadd.f32 %v254_v18, %v86_v17  ;;  %v1075_v20 = vpop.f32.mrb[7].mxu0  ;;  %v327_v17 = vpop.permute.xlu1 %326 }
 0x125   :  { %v276_v22 = vmax.f32 %v255_v19, 0.0 }
 0x126   :  { %v259_v23 = vpop.f32.mrb[8].mxu0 }
 0x127   :  { %v1243_v24 = vpack.c.bf16 %v276_v22, %v275_v21  ;;  %v1078_v25 = vpop.f32.mrb[9].mxu0  ;;  %v260_v27 = vadd.f32 %v259_v23, %v91_v26  ;;  %v462_v23 = vld [vmem:[%s1715_s5] sm:$0xff]  ;;  %v465_v26 = vld [vmem:[%s1715_s5 + $0x18] sm:$0xff] }
 0x128   :  { %v464_v25 = vld [vmem:[%s1715_s5 + $0x10] sm:$0xff] }
 0x129   :  { %1244 = vmatpush3.bf16.msra.mxu1 %v1243_v24  ;;  %v277_v32 = vmax.f32 %v260_v27, 0.0  ;;  %v463_v24 = vld [vmem:[%s1715_s5 + $0x8] sm:$0xff]  ;;  %v466_v27 = vld [vmem:[%s1715_s5 + $0x20] sm:$0xff] }
 0x12a   :  { %v264_v29 = vpop.f32.mrb[10].mxu0  ;;  %1245 = vmatprep.subr.bf16.mxu1 %v1281_v0 }
 0x12b   :  { %v265_v30 = vadd.f32 %v264_v29, %v96_v28  ;;  %v1081_v31 = vpop.f32.mrb[11].mxu0  ;;  %v467_v28 = vld [vmem:[%s1715_s5 + $0x28] sm:$0xff]  ;;  %v468_v29 = vld [vmem:[%s1715_s5 + $0x30] sm:$0x3] }
 0x12d   :  { %v278_v33 = vmax.f32 %v265_v30, 0.0 }
 0x12e   :  { %v269_v35 = vpop.f32.mrb[12].mxu0 }
 0x12f   :  { %v1246_v36 = vpack.c.bf16 %v278_v33, %v277_v32  ;;  %v270_v37 = vadd.f32 %v269_v35, %v101_v34  ;;  %v1084_v38 = vpop.f32.mrb[13].mxu0  ;;  %v479_v32 = vpop.permute.xlu0 %478 }
 0x130   :  { %v484_v34 = vpop.permute.xlu1 %483 }
 0x131   :  { %1247 = vmatpush3.bf16.msra.mxu1 %v1246_v36  ;;  %v279_v39 = vmax.f32 %v270_v37, 0.0 }
 0x132   :  { %1097 = vmatprep.subr.mxu1 %v1283_v4 }
 0x135   :  { %1098 = vmatpush3.msk.msra.mxu1 %vm351_vm3, %v279_v39 }
 0x136   :  { %1100 = vmatmul.mubr.msk.f32.vlgmr.msra.gmra.mrb[0].mxu1 %vm329_vm4, %v280_v40  ;;  %1248 = vmatprep.subr.bf16.mxu1 %v1281_v0 }
 0x137   :  { %1102 = vmatprep.mubr.msk.f32.mxu1 %vm1282_vm2, %v1283_v4 }
 0x13a   :  { %1103 = vmatmul.mubr.msk.f32.gmra.mrb[2].mxu1 %vm329_vm4, %v281_v41 }
 0x13b   :  { %1105 = vmatprep.mubr.msk.f32.mxu1 %vm1282_vm2, %v1283_v4 }
 0x13e   :  { %1106 = vmatmul.mubr.msk.f32.gmra.mrb[4].mxu1 %vm329_vm4, %v282_v42 }
 0x13f   :  { %1108 = vmatprep.mubr.msk.f32.mxu1 %vm1282_vm2, %v1283_v4 }
 0x142   :  { %1109 = vmatmul.mubr.msk.f32.gmra.mrb[6].mxu1 %vm329_vm4, %v283_v43  ;;  %v489_v43 = vpop.permute.xlu0 %488 }
 0x143   :  { %1111 = vmatprep.mubr.msk.f32.mxu1 %vm1282_vm2, %v1283_v4 }
 0x146   :  { %1112 = vmatmul.mubr.msk.f32.gmra.mrb[8].mxu1 %vm329_vm4, %v284_v44 }
 0x147   :  { %1114 = vmatprep.mubr.msk.f32.mxu1 %vm1282_vm2, %v1283_v4 }
 0x14a   :  { %1115 = vmatmul.mubr.msk.f32.gmra.mrb[10].mxu1 %vm329_vm4, %v285_v45  ;;  %v494_v45 = vpop.permute.xlu1 %493 }
 0x14b   :  { %1117 = vmatprep.mubr.msk.f32.mxu1 %vm1282_vm2, %v1283_v4 }
 0x14e   :  { %1118 = vmatmul.mubr.msk.f32.gmra.mrb[12].mxu1 %vm329_vm4, %v286_v46 }
 0x14f   :  { %1134 = vmatprep.mubr.msk.f32.mxu1 %vm1282_vm2, %v1283_v4 }
 0x209   :  { %v421_v47 = vpop.f32.mrb[0].mxu1 }
 0x20a   :  { %v1101_v48 = vpop.f32.mrb[1].mxu1  ;;  %v422_v50 = vadd.f32 %v421_v47, %v297_v49 }
 0x20c   :  { %v455_v55 = vmax.f32 %v422_v50, 0.0 }
 0x20d   :  { %v426_v52 = vpop.f32.mrb[2].mxu1 }
 0x20e   :  { %v427_v53 = vadd.f32 %v426_v52, %v302_v51  ;;  %v1104_v54 = vpop.f32.mrb[3].mxu1 }
 0x20f   :  { %v499_v54 = vpop.permute.xlu0 %498 }
 0x210   :  { %v456_v56 = vmax.f32 %v427_v53, 0.0 }
 0x211   :  { %v431_v57 = vpop.f32.mrb[4].mxu1 }
 0x212   :  { %v1249_v58 = vpack.c.bf16 %v456_v56, %v455_v55  ;;  %v1107_v59 = vpop.f32.mrb[5].mxu1  ;;  %v432_v61 = vadd.f32 %v431_v57, %v307_v60  ;;  %v504_v56 = vpop.permute.xlu1 %503 }
 0x214   :  { %1250 = vmatpush3.bf16.msra.mxu1 %v1249_v58  ;;  %v457_v3 = vmax.f32 %v432_v61, 0.0 }
 0x215   :  { %v436_v63 = vpop.f32.mrb[6].mxu1  ;;  %1251 = vmatprep.subr.bf16.mxu1 %v1281_v0 }
 0x216   :  { %v437_v1 = vadd.f32 %v436_v63, %v312_v62  ;;  %v1110_v2 = vpop.f32.mrb[7].mxu1  ;;  %v509_v62 = vpop.permute.xlu0 %508 }
 0x218   :  { %v458_v5 = vmax.f32 %v437_v1, 0.0 }
 0x219   :  { %v441_v6 = vpop.f32.mrb[8].mxu1 }
 0x21a   :  { %v1252_v7 = vpack.c.bf16 %v458_v5, %v457_v3  ;;  %v1113_v8 = vpop.f32.mrb[9].mxu1  ;;  %v442_v10 = vadd.f32 %v441_v6, %v317_v9  ;;  %v642_v6 = vld [vmem:[%s1716_s7] sm:$0xff]  ;;  %v645_v9 = vld [vmem:[%s1716_s7 + $0x18] sm:$0xff] }
 0x21b   :  { %v644_v8 = vld [vmem:[%s1716_s7 + $0x10] sm:$0xff] }
 0x21c   :  { %1253 = vmatpush3.bf16.msra.mxu1 %v1252_v7  ;;  %v459_v15 = vmax.f32 %v442_v10, 0.0  ;;  %v643_v7 = vld [vmem:[%s1716_s7 + $0x8] sm:$0xff]  ;;  %v646_v10 = vld [vmem:[%s1716_s7 + $0x20] sm:$0xff] }
 0x21d   :  { %v446_v12 = vpop.f32.mrb[10].mxu1  ;;  %1254 = vmatprep.subr.bf16.mxu1 %v1281_v0 }
 0x21e   :  { %v447_v13 = vadd.f32 %v446_v12, %v322_v11  ;;  %v1116_v14 = vpop.f32.mrb[11].mxu1  ;;  %v647_v11 = vld [vmem:[%s1716_s7 + $0x28] sm:$0xff]  ;;  %v648_v12 = vld [vmem:[%s1716_s7 + $0x30] sm:$0x3] }
 0x220   :  { %v460_v16 = vmax.f32 %v447_v13, 0.0 }
 0x221   :  { %v451_v18 = vpop.f32.mrb[12].mxu1 }
 0x222   :  { %v1255_v19 = vpack.c.bf16 %v460_v16, %v459_v15  ;;  %v452_v20 = vadd.f32 %v451_v18, %v327_v17  ;;  %v1119_v21 = vpop.f32.mrb[13].mxu1  ;;  %v659_v15 = vpop.permute.xlu1 %658 }
 0x223   :  { %v664_v17 = vpop.permute.xlu0 %663 }
 0x224   :  { %1256 = vmatpush3.bf16.msra.mxu1 %v1255_v19  ;;  %v461_v22 = vmax.f32 %v452_v20, 0.0 }
 0x225   :  { %1132 = vmatprep.subr.mxu1 %v1283_v4 }
 0x228   :  { %1133 = vmatpush3.msk.msra.mxu1 %vm351_vm3, %v461_v22 }
 0x229   :  { %1135 = vmatmul.mubr.msk.f32.vlgmr.msra.gmra.mrb[14].mxu1 %vm329_vm4, %v462_v23  ;;  %1257 = vmatprep.subr.bf16.mxu1 %v1281_v0 }
 0x22a   :  { %1137 = vmatprep.mubr.msk.f32.mxu1 %vm1282_vm2, %v1283_v4 }
 0x22d   :  { %1138 = vmatmul.mubr.msk.f32.gmra.mrb[16].mxu1 %vm329_vm4, %v463_v24 }
 0x22e   :  { %1140 = vmatprep.mubr.msk.f32.mxu1 %vm1282_vm2, %v1283_v4 }
 0x231   :  { %1141 = vmatmul.mubr.msk.f32.gmra.mrb[18].mxu1 %vm329_vm4, %v464_v25 }
 0x232   :  { %1143 = vmatprep.mubr.msk.f32.mxu1 %vm1282_vm2, %v1283_v4 }
 0x235   :  { %1144 = vmatmul.mubr.msk.f32.gmra.mrb[20].mxu1 %vm329_vm4, %v465_v26  ;;  %v669_v26 = vpop.permute.xlu1 %668 }
 0x236   :  { %1146 = vmatprep.mubr.msk.f32.mxu1 %vm1282_vm2, %v1283_v4 }
 0x239   :  { %1147 = vmatmul.mubr.msk.f32.gmra.mrb[22].mxu1 %vm329_vm4, %v466_v27 }
 0x23a   :  { %1149 = vmatprep.mubr.msk.f32.mxu1 %vm1282_vm2, %v1283_v4 }
 0x23d   :  { %1150 = vmatmul.mubr.msk.f32.gmra.mrb[24].mxu1 %vm329_vm4, %v467_v28  ;;  %v674_v28 = vpop.permute.xlu0 %673 }
 0x23e   :  { %1152 = vmatprep.mubr.msk.f32.mxu1 %vm1282_vm2, %v1283_v4 }
 0x241   :  { %1153 = vmatmul.mubr.msk.f32.gmra.mrb[26].mxu1 %vm329_vm4, %v468_v29 }
 0x242   :  { %1169 = vmatprep.mubr.msk.f32.mxu1 %vm1282_vm2, %v1283_v4 }
 0x2fc   :  { %v601_v30 = vpop.f32.mrb[14].mxu1 }
 0x2fd   :  { %v1136_v31 = vpop.f32.mrb[15].mxu1  ;;  %v602_v33 = vadd.f32 %v601_v30, %v479_v32 }
 0x2ff   :  { %v635_v38 = vmax.f32 %v602_v33, 0.0 }
 0x300   :  { %v606_v35 = vpop.f32.mrb[16].mxu1 }
 0x301   :  { %v607_v36 = vadd.f32 %v606_v35, %v484_v34  ;;  %v1139_v37 = vpop.f32.mrb[17].mxu1 }
 0x302   :  { %v679_v37 = vpop.permute.xlu1 %678 }
 0x303   :  { %v636_v39 = vmax.f32 %v607_v36, 0.0 }
 0x304   :  { %v611_v40 = vpop.f32.mrb[18].mxu1 }
 0x305   :  { %v1258_v41 = vpack.c.bf16 %v636_v39, %v635_v38  ;;  %v1142_v42 = vpop.f32.mrb[19].mxu1  ;;  %v612_v44 = vadd.f32 %v611_v40, %v489_v43  ;;  %v684_v39 = vpop.permute.xlu0 %683 }
 0x307   :  { %1259 = vmatpush3.bf16.msra.mxu1 %v1258_v41  ;;  %v637_v49 = vmax.f32 %v612_v44, 0.0 }
 0x308   :  { %v616_v46 = vpop.f32.mrb[20].mxu1  ;;  %1260 = vmatprep.subr.bf16.mxu1 %v1281_v0 }
 0x309   :  { %v617_v47 = vadd.f32 %v616_v46, %v494_v45  ;;  %v1145_v48 = vpop.f32.mrb[21].mxu1  ;;  %v689_v45 = vpop.permute.xlu1 %688 }
 0x30b   :  { %v638_v50 = vmax.f32 %v617_v47, 0.0 }
 0x30c   :  { %v621_v51 = vpop.f32.mrb[22].mxu1 }
 0x30d   :  { %v1261_v52 = vpack.c.bf16 %v638_v50, %v637_v49  ;;  %v1148_v53 = vpop.f32.mrb[23].mxu1  ;;  %v622_v55 = vadd.f32 %v621_v51, %v499_v54  ;;  %v822_v51 = vld [vmem:[%s1717_s9] sm:$0x3] }
 0x30f   :  { %1262 = vmatpush3.bf16.msra.mxu1 %v1261_v52  ;;  %v639_v60 = vmax.f32 %v622_v55, 0.0 }
 0x310   :  { %v626_v57 = vpop.f32.mrb[24].mxu1  ;;  %1263 = vmatprep.subr.bf16.mxu1 %v1281_v0 }
 0x311   :  { %v627_v58 = vadd.f32 %v626_v57, %v504_v56  ;;  %v1151_v59 = vpop.f32.mrb[25].mxu1 }
 0x313   :  { %v640_v61 = vmax.f32 %v627_v58, 0.0 }
 0x314   :  { %v631_v63 = vpop.f32.mrb[26].mxu1 }
 0x315   :  { %v1264_v1 = vpack.c.bf16 %v640_v61, %v639_v60  ;;  %v632_v2 = vadd.f32 %v631_v63, %v509_v62  ;;  %v1154_v3 = vpop.f32.mrb[27].mxu1 }
 0x317   :  { %1265 = vmatpush3.bf16.msra.mxu1 %v1264_v1  ;;  %v641_v5 = vmax.f32 %v632_v2, 0.0 }
 0x318   :  { %1167 = vmatprep.subr.mxu1 %v1283_v4 }
 0x31b   :  { %1168 = vmatpush3.msk.msra.mxu1 %vm351_vm3, %v641_v5 }
 0x31c   :  { %1170 = vmatmul.mubr.msk.f32.vlgmr.msra.gmra.mrb[28].mxu1 %vm329_vm4, %v642_v6 }
 0x31d   :  { %1172 = vmatprep.mubr.msk.f32.mxu1 %vm1282_vm2, %v1283_v4 }
 0x320   :  { %1173 = vmatmul.mubr.msk.f32.gmra.mrb[30].mxu1 %vm329_vm4, %v643_v7 }
 0x321   :  { %1175 = vmatprep.mubr.msk.f32.mxu1 %vm1282_vm2, %v1283_v4 }
 0x324   :  { %1176 = vmatmul.mubr.msk.f32.gmra.mrb[32].mxu1 %vm329_vm4, %v644_v8 }
 0x325   :  { %1178 = vmatprep.mubr.msk.f32.mxu1 %vm1282_vm2, %v1283_v4 }
 0x328   :  { %1179 = vmatmul.mubr.msk.f32.gmra.mrb[34].mxu1 %vm329_vm4, %v645_v9 }
 0x329   :  { %1181 = vmatprep.mubr.msk.f32.mxu1 %vm1282_vm2, %v1283_v4 }
 0x32c   :  { %1182 = vmatmul.mubr.msk.f32.gmra.mrb[36].mxu1 %vm329_vm4, %v646_v10 }
 0x32d   :  { %1184 = vmatprep.mubr.msk.f32.mxu1 %vm1282_vm2, %v1283_v4 }
 0x330   :  { %1185 = vmatmul.mubr.msk.f32.gmra.mrb[38].mxu1 %vm329_vm4, %v647_v11 }
 0x331   :  { %1187 = vmatprep.mubr.msk.f32.mxu1 %vm1282_vm2, %v1283_v4 }
 0x334   :  { %1188 = vmatmul.mubr.msk.f32.gmra.mrb[40].mxu1 %vm329_vm4, %v648_v12 }
 0x3ef   :  { %v781_v13 = vpop.f32.mrb[28].mxu1 }
 0x3f0   :  { %v1171_v14 = vpop.f32.mrb[29].mxu1  ;;  %v782_v16 = vadd.f32 %v781_v13, %v659_v15 }
 0x3f2   :  { %v815_v21 = vmax.f32 %v782_v16, 0.0 }
 0x3f3   :  { %v786_v18 = vpop.f32.mrb[30].mxu1 }
 0x3f4   :  { %v787_v19 = vadd.f32 %v786_v18, %v664_v17  ;;  %v1174_v20 = vpop.f32.mrb[31].mxu1 }
 0x3f6   :  { %v816_v22 = vmax.f32 %v787_v19, 0.0 }
 0x3f7   :  { %v791_v23 = vpop.f32.mrb[32].mxu1 }
 0x3f8   :  { %v1267_v24 = vpack.c.bf16 %v816_v22, %v815_v21  ;;  %v1177_v25 = vpop.f32.mrb[33].mxu1  ;;  %v792_v27 = vadd.f32 %v791_v23, %v669_v26 }
 0x3fa   :  { %1268 = vmatpush3.bf16.msra.mxu0 %v1267_v24  ;;  %v817_v32 = vmax.f32 %v792_v27, 0.0 }
 0x3fb   :  { %v796_v29 = vpop.f32.mrb[34].mxu1  ;;  %1269 = vmatprep.subr.bf16.mxu0 %v1281_v0 }
 0x3fc   :  { %v797_v30 = vadd.f32 %v796_v29, %v674_v28  ;;  %v1180_v31 = vpop.f32.mrb[35].mxu1 }
 0x3fe   :  { %v818_v33 = vmax.f32 %v797_v30, 0.0 }
 0x3ff   :  { %v801_v34 = vpop.f32.mrb[36].mxu1 }
 0x400   :  { %v1270_v35 = vpack.c.bf16 %v818_v33, %v817_v32  ;;  %v1183_v36 = vpop.f32.mrb[37].mxu1  ;;  %v802_v38 = vadd.f32 %v801_v34, %v679_v37 }
 0x402   :  { %1271 = vmatpush3.bf16.msra.mxu0 %v1270_v35  ;;  %v819_v43 = vmax.f32 %v802_v38, 0.0 }
 0x403   :  { %v806_v40 = vpop.f32.mrb[38].mxu1  ;;  %1272 = vmatprep.subr.bf16.mxu0 %v1281_v0  ;;  %v827_v0 = vpop.permute.xlu0 %826 }
 0x404   :  { %v807_v41 = vadd.f32 %v806_v40, %v684_v39  ;;  %v1186_v42 = vpop.f32.mrb[39].mxu1 }
 0x406   :  { %v820_v44 = vmax.f32 %v807_v41, 0.0 }
 0x407   :  { %v811_v46 = vpop.f32.mrb[40].mxu1 }
 0x408   :  { %v1273_v47 = vpack.c.bf16 %v820_v44, %v819_v43  ;;  %v812_v48 = vadd.f32 %v811_v46, %v689_v45  ;;  %v1189_v49 = vpop.f32.mrb[41].mxu1 }
 0x40a   :  { %1274 = vmatpush3.bf16.msra.mxu0 %v1273_v47  ;;  %v821_v50 = vmax.f32 %v812_v48, 0.0 }
 0x40b   :  { %1202 = vmatprep.subr.mxu0 %v1283_v4 }
 0x40e   :  { %1203 = vmatpush3.msk.msra.mxu0 %vm351_vm3, %v821_v50 }
 0x40f   :  { %1205 = vmatmul.mubr.msk.f32.vlgmr.msra.gmra.mrb[14].mxu0 %vm329_vm4, %v822_v51 }
 0x4e2   :  { %v901_v52 = vpop.f32.mrb[14].mxu0 }
 0x4e3   :  { %v902_v53 = vadd.f32 %v901_v52, %v827_v0  ;;  %v1206_v54 = vpop.f32.mrb[15].mxu0 }
 0x4e5   :  { %905 = vst [vmem:[%s1718_s11] sm:$0x3] %v902_v53 }

</bundles_post_ra>
